<compile_context>
chip_gen: v5e
topology: v5e:2x2
jax: 0.10.0
libtpu: 0.0.40
codegen_flags: <defaults>
</compile_context>

<pallas_src>
import functools

import jax
import jax.numpy as jnp
from jax.experimental import pallas as pl
from jax.experimental.pallas import tpu as pltpu


def _patch_merging_kernel(x_ref, w_ref, b_ref, o_ref, *, eps, inv_c, mxu_dtype):
    # x_ref : (4, Cp, st)      four conv taps (k = kh*2 + kw), channels on sublane,
    #                          spatial on lane; channels zero-padded to Cp (8-mult).
    # w_ref : (Cout, 4*Cp)     conv weight, tap-major K, gamma folded in, zero-padded.
    # b_ref : (Cout, 1)        conv bias with folded beta term.
    # o_ref : (Cout, st)       output tile (spatial lane-dense).
    x = x_ref[...].astype(jnp.float32)                       # (4, Cp, st)
    k4, cp, st = x.shape

    # One-pass LayerNorm statistics per (tap, spatial column) over the true C
    # channels (padded rows are zero so they do not perturb the sums).
    s1 = jnp.sum(x, axis=1, keepdims=True)                   # (4, 1, st)
    s2 = jnp.sum(x * x, axis=1, keepdims=True)               # (4, 1, st)
    mean = s1 * inv_c
    var = jnp.maximum(s2 * inv_c - mean * mean, 0.0)
    xn = (x - mean) * jax.lax.rsqrt(var + eps)               # (4, Cp, st)

    # Layout-free merge (Cp % 8 == 0) -> single deep-K MXU matmul.
    xn2 = xn.reshape(k4 * cp, st)                            # (4*Cp, st)
    w = w_ref[...]
    if mxu_dtype is not None:
        xn2 = xn2.astype(mxu_dtype)
        w = w.astype(mxu_dtype)
    else:
        w = w.astype(jnp.float32)
    acc = jnp.dot(w, xn2, preferred_element_type=jnp.float32)  # (Cout, st)
    o_ref[...] = (acc + b_ref[...].astype(jnp.float32)).astype(o_ref.dtype)


def patch_merging_forward(x, conv_w, conv_b, ln_gamma, ln_beta, *,
                          s_tile=2048, eps=1e-5, mxu_dtype=None):
    """x: (N, C, H, W), conv_w: (2C, C, 2, 2), conv_b: (2C,), ln_gamma/ln_beta: (C,).
    Returns (N, 2C, H//2, W//2) — same semantics as the PyTorch PatchMerging.forward."""
    N, C, H, W = x.shape
    assert H % 2 == 0 and W % 2 == 0, "PatchMerging needs even spatial dims"
    Cout = conv_w.shape[0]
    Ho, Wo = H // 2, W // 2
    S = Ho * Wo
    itemsize = jnp.dtype(x.dtype).itemsize
    Cp = ((C + 7) // 8) * 8   # sublane-aligned channel count

    # Space-to-depth: (N,C,H,W) -> (N, 4, Cp, S), tap k = kh*2 + kw.  Channels are
    # zero-padded so the in-kernel (4,Cp,st)->(4Cp,st) merge is layout-free.
    xr = x.reshape(N, C, Ho, 2, Wo, 2)
    xr = jnp.transpose(xr, (0, 3, 5, 1, 2, 4)).reshape(N, 4, C, S)
    if Cp != C:
        xr = jnp.pad(xr, ((0, 0), (0, 0), (0, Cp - C), (0, 0)))

    # Fold LayerNorm affine into the conv weights / bias (mathematically exact):
    #   W'_k = W_k * gamma (per input channel),  b' = conv_b + sum_k W_k @ beta.
    w_taps = jnp.transpose(conv_w, (2, 3, 0, 1)).reshape(4, Cout, C).astype(jnp.float32)
    gamma = ln_gamma.astype(jnp.float32)
    beta = ln_beta.astype(jnp.float32)
    w_scaled = w_taps * gamma[None, None, :]
    if Cp != C:
        w_scaled = jnp.pad(w_scaled, ((0, 0), (0, 0), (0, Cp - C)))
    # Tap-major contraction axis to match the kernel's (4, Cp, st)->(4Cp, st) merge.
    w_fused = jnp.transpose(w_scaled, (1, 0, 2)).reshape(Cout, 4 * Cp)
    if mxu_dtype is not None:
        w_fused = w_fused.astype(mxu_dtype)
    bias_fused = (conv_b.astype(jnp.float32)
                  + jnp.einsum("koc,c->o", w_taps, beta)).reshape(Cout, 1)

    # Spatial tile: full extent when small; else a 128-multiple, shrunk until the
    # working set fits a v7x-safe 32 MiB budget (v5e/v6e have more VMEM but this
    # tile size already sits well past the per-step-overhead knee).
    param_bytes = (Cout * 4 * Cp + Cout) * 4

    def _need(t):
        in_blk = 4 * Cp * t * itemsize
        out_blk = Cout * t * itemsize
        in_f32 = 4 * Cp * t * 4
        out_f32 = Cout * t * 4
        return (2 * (in_blk + out_blk) + 2 * param_bytes
                + 2 * in_f32 + out_f32 + (2 << 20))

    cap = 32 << 20
    if S <= s_tile:
        st = S
    else:
        st = max(128, (s_tile // 128) * 128)
    while _need(st) > cap and st > 128 and st % 256 == 0:
        st //= 2
    s_pad = ((S + st - 1) // st) * st
    if s_pad != S:
        xr = jnp.pad(xr, ((0, 0), (0, 0), (0, 0), (0, s_pad - S)))
    need = _need(st)
    vmem_limit = int(min(max(need, 16 << 20), cap)) if need <= cap else int(need)

    cost = pl.CostEstimate(
        flops=int(N * s_pad * (2 * 4 * Cp * Cout + 6 * 4 * Cp)),
        transcendentals=int(N * s_pad * 4),
        bytes_accessed=int(xr.size * itemsize + N * Cout * s_pad * itemsize
                           + param_bytes),
    )

    out = pl.pallas_call(
        functools.partial(_patch_merging_kernel, eps=eps, inv_c=1.0 / C,
                          mxu_dtype=mxu_dtype),
        out_shape=jax.ShapeDtypeStruct((N, Cout, s_pad), x.dtype),
        grid_spec=pltpu.PrefetchScalarGridSpec(
            num_scalar_prefetch=0,
            # Spatial axis first so megacore (v7x 2 TCs) shards it even when N is 1/odd.
            grid=(s_pad // st, N),
            in_specs=[
                pl.BlockSpec((None, 4, Cp, st), lambda s, n: (n, 0, 0, s)),
                pl.BlockSpec((Cout, 4 * Cp), lambda s, n: (0, 0)),
                pl.BlockSpec((Cout, 1), lambda s, n: (0, 0)),
            ],
            out_specs=pl.BlockSpec((None, Cout, st), lambda s, n: (n, 0, s)),
        ),
        compiler_params=pltpu.CompilerParams(
            dimension_semantics=("parallel", "parallel"),
            vmem_limit_bytes=vmem_limit,
            # Let XLA fuse the wrapper-side space-to-depth transpose/pad into the
            # kernel's input pipeline (avoids a standalone HBM round trip).
            allow_input_fusion=[True, False, False],
        ),
        cost_estimate=cost,
    )(xr, w_fused, bias_fused)

    # (N, Cout, S) -> (N, Cout, Ho, Wo): pure reshape, no transpose.
    return out[:, :, :S].reshape(N, Cout, Ho, Wo)


def _reference(x, conv_w, conv_b, ln_gamma, ln_beta, eps=1e-5):
    # Pure-JAX reference of the PyTorch forward.
    N, C, H, W = x.shape
    xt = jnp.transpose(x, (0, 2, 3, 1)).astype(jnp.float32)      # NHWC
    mu = jnp.mean(xt, axis=-1, keepdims=True)
    var = jnp.mean(jnp.square(xt - mu), axis=-1, keepdims=True)
    xn = (xt - mu) * jax.lax.rsqrt(var + eps) * ln_gamma + ln_beta
    xn = jnp.transpose(xn, (0, 3, 1, 2))                         # NCHW
    Ho, Wo = H // 2, W // 2
    patches = xn.reshape(N, C, Ho, 2, Wo, 2)
    y = jnp.einsum("ncikjl,ockl->noij", patches, conv_w,
                   precision=jax.lax.Precision.HIGHEST)
    return y + conv_b[None, :, None, None]


if __name__ == "__main__":
    key = jax.random.PRNGKey(0)
    N, dim, H, W = 2, 4, 16, 16
    Cout = 2 * dim

    kx, kw, kb, kg, kbt = jax.random.split(key, 5)
    x = jax.random.normal(kx, (N, dim, H, W), dtype=jnp.float32)

    # Conv2d-style init (kaiming-uniform bounds, fan_in = dim*2*2).
    bound = 1.0 / ((dim * 2 * 2) ** 0.5)
    conv_w = jax.random.uniform(kw, (Cout, dim, 2, 2), minval=-bound, maxval=bound,
                                dtype=jnp.float32)
    conv_b = jax.random.uniform(kb, (Cout,), minval=-bound, maxval=bound,
                                dtype=jnp.float32)
    # LayerNorm defaults are gamma=1, beta=0; perturb slightly to exercise the affine path.
    ln_gamma = 1.0 + 0.1 * jax.random.normal(kg, (dim,), dtype=jnp.float32)
    ln_beta = 0.1 * jax.random.normal(kbt, (dim,), dtype=jnp.float32)

    out = patch_merging_forward(x, conv_w, conv_b, ln_gamma, ln_beta)
    out = jax.block_until_ready(out)

    ref = _reference(x, conv_w, conv_b, ln_gamma, ln_beta)
    assert out.shape == (N, Cout, H // 2, W // 2)
    max_err = float(jnp.max(jnp.abs(out - ref)))
    assert jnp.allclose(out, ref, atol=1e-4, rtol=1e-4), f"max abs err = {max_err}"

    print("KERNEL_OK")
</pallas_src>

<mosaic_0001>
module attributes {stable_mosaic.version = 11 : i64} {
  func.func @_patch_merging_kernel(%arg0: i32, %arg1: i32, %arg2: memref<1x4x8x64xf32, #tpu.memory_space<vmem>>, %arg3: memref<8x32xf32, #tpu.memory_space<vmem>>, %arg4: memref<8x1xf32, #tpu.memory_space<vmem>>, %arg5: memref<1x8x64xf32, #tpu.memory_space<vmem>>) attributes {dimension_semantics = [#tpu.dimension_semantics<parallel>, #tpu.dimension_semantics<parallel>], iteration_bounds = array<i64: 1, 2>, scalar_prefetch = 0 : i64, scratch_operands = 0 : i64, tpu.core_type = #tpu.core_type<tc>, window_params = [{transform_indices = @transform_0, window_bounds = array<i64: 1, 4, 8, 64>}, {pipeline_mode = #tpu.pipeline_mode<synchronous>, transform_indices = @transform_1, window_bounds = array<i64: 8, 32>}, {pipeline_mode = #tpu.pipeline_mode<synchronous>, transform_indices = @transform_2, window_bounds = array<i64: 8, 1>}, {transform_indices = @transform_3, window_bounds = array<i64: 1, 8, 64>}]} {
    %c0 = arith.constant 0 : index
    %c0_0 = arith.constant 0 : index
    %c0_1 = arith.constant 0 : index
    %c0_2 = arith.constant 0 : index
    %0 = vector.load %arg2[%c0, %c0_0, %c0_1, %c0_2] : memref<1x4x8x64xf32, #tpu.memory_space<vmem>>, vector<1x4x8x64xf32>
    %1 = vector.shape_cast %0 : vector<1x4x8x64xf32> to vector<4x8x64xf32>
    %cst = arith.constant dense<0.000000e+00> : vector<4x64xf32>
    %2 = vector.multi_reduction <add>, %1, %cst [1] : vector<4x8x64xf32> to vector<4x64xf32>
    %3 = vector.shape_cast %2 : vector<4x64xf32> to vector<4x1x64xf32>
    %4 = arith.mulf %1, %1 : vector<4x8x64xf32>
    %cst_3 = arith.constant dense<0.000000e+00> : vector<4x64xf32>
    %5 = vector.multi_reduction <add>, %4, %cst_3 [1] : vector<4x8x64xf32> to vector<4x64xf32>
    %6 = vector.shape_cast %5 : vector<4x64xf32> to vector<4x1x64xf32>
    %cst_4 = arith.constant 2.500000e-01 : f32
    %7 = vector.broadcast %cst_4 : f32 to vector<4x1x64xf32>
    %8 = arith.mulf %3, %7 : vector<4x1x64xf32>
    %cst_5 = arith.constant 2.500000e-01 : f32
    %9 = vector.broadcast %cst_5 : f32 to vector<4x1x64xf32>
    %10 = arith.mulf %6, %9 : vector<4x1x64xf32>
    %11 = arith.mulf %8, %8 : vector<4x1x64xf32>
    %12 = arith.subf %10, %11 : vector<4x1x64xf32>
    %cst_6 = arith.constant 0.000000e+00 : f32
    %13 = vector.broadcast %cst_6 : f32 to vector<4x1x64xf32>
    %14 = arith.maximumf %12, %13 : vector<4x1x64xf32>
    %15 = vector.broadcast %8 : vector<4x1x64xf32> to vector<4x8x64xf32>
    %16 = arith.subf %1, %15 : vector<4x8x64xf32>
    %cst_7 = arith.constant 9.99999974E-6 : f32
    %17 = vector.broadcast %cst_7 : f32 to vector<4x1x64xf32>
    %18 = arith.addf %14, %17 : vector<4x1x64xf32>
    %19 = math.rsqrt %18 : vector<4x1x64xf32>
    %20 = vector.broadcast %19 : vector<4x1x64xf32> to vector<4x8x64xf32>
    %21 = arith.mulf %16, %20 : vector<4x8x64xf32>
    %22 = vector.shape_cast %21 : vector<4x8x64xf32> to vector<32x64xf32>
    %c0_8 = arith.constant 0 : index
    %c0_9 = arith.constant 0 : index
    %23 = vector.load %arg3[%c0_8, %c0_9] : memref<8x32xf32, #tpu.memory_space<vmem>>, vector<8x32xf32>
    %cst_10 = arith.constant dense<0.000000e+00> : vector<8x64xf32>
    %24 = tpu.matmul %23, %22, %cst_10 {dimension_numbers = #tpu.dot_dimension_numbers<[1], [0], [0], [1], [0, 0, 1, 1], [], []>} : vector<8x32xf32>, vector<32x64xf32>, vector<8x64xf32> -> vector<8x64xf32>
    %c0_11 = arith.constant 0 : index
    %c0_12 = arith.constant 0 : index
    %25 = vector.load %arg4[%c0_11, %c0_12] : memref<8x1xf32, #tpu.memory_space<vmem>>, vector<8x1xf32>
    %26 = vector.broadcast %25 : vector<8x1xf32> to vector<8x64xf32>
    %27 = arith.addf %24, %26 : vector<8x64xf32>
    %c0_13 = arith.constant 0 : index
    %c0_14 = arith.constant 0 : index
    %c0_15 = arith.constant 0 : index
    %28 = vector.load %arg5[%c0_13, %c0_14, %c0_15] : memref<1x8x64xf32, #tpu.memory_space<vmem>>, vector<1x8x64xf32>
    %29 = vector.shape_cast %28 : vector<1x8x64xf32> to vector<8x64xf32>
    %30 = vector.shape_cast %27 : vector<8x64xf32> to vector<1x8x64xf32>
    tpu.vector_store %arg5[%c0_13, %c0_14, %c0_15], %30 {strides = array<i32>} : memref<1x8x64xf32, #tpu.memory_space<vmem>>, vector<1x8x64xf32>,
    return
  }
  func.func @transform_0(%arg0: i32, %arg1: i32) -> (i32, i32, i32, i32) {
    %c0_i32 = arith.constant 0 : i32
    %c0_i32_0 = arith.constant 0 : i32
    %c0_i32_1 = arith.constant 0 : i32
    return %arg1, %c0_i32, %c0_i32_0, %arg0 : i32, i32, i32, i32
  }
  func.func @transform_1(%arg0: i32, %arg1: i32) -> (i32, i32) {
    %c0_i32 = arith.constant 0 : i32
    %c0_i32_0 = arith.constant 0 : i32
    %c0_i32_1 = arith.constant 0 : i32
    return %c0_i32, %c0_i32_0 : i32, i32
  }
  func.func @transform_2(%arg0: i32, %arg1: i32) -> (i32, i32) {
    %c0_i32 = arith.constant 0 : i32
    %c0_i32_0 = arith.constant 0 : i32
    %c0_i32_1 = arith.constant 0 : i32
    return %c0_i32, %c0_i32_0 : i32, i32
  }
  func.func @transform_3(%arg0: i32, %arg1: i32) -> (i32, i32, i32) {
    %c0_i32 = arith.constant 0 : i32
    %c0_i32_0 = arith.constant 0 : i32
    return %arg1, %c0_i32, %arg0 : i32, i32, i32
  }
}

</mosaic_0001>

<bundles_post_ra>
// kernel: tpu_custom_call.1
= control target key start
LH: loop header
LB: loop body
LE: loop exit
PB: predicated region body
PF: predicated region fallthrough
CT: control target
= control target key end

     0   :  { %8 = vsyncpa [#allocation3], 0  ;;  %s888_s0 = inlined_call_operand.hbm [shape: f32[2,4,8,64], index: 0, kind: input, shape index: {}]   ;;  %s889_s1 = inlined_call_operand.vmem [shape: f32[8,32], index: 1, kind: input, shape index: {}]   ;;  %s890_s2 = inlined_call_operand.vmem [shape: f32[8,1], index: 2, kind: input, shape index: {}]   ;;  %s891_s3 = inlined_call_operand.hbm [shape: f32[2,8,64], index: 3, kind: output, shape index: {}]  }
   0x1   :  { %10 = vsyncpa [#allocation3 + $0x1], 0 }
   0x2   :  { %11 = vsyncpa [#allocation4], 0 }
   0x3   :  { %13 = vsyncpa [#allocation4 + $0x1], 0  ;;  %s702_s12 = smov 0   ;;  %s704_s13 = smov 0  }
   0x4   :  { %s706_s14 = smov 0   ;;  %s708_s15 = smov 0  }
   0x5   :  { %s710_s16 = smov 0   ;;  %s712_s17 = smov 0  }
   0x6 LB: > { %s475_s18 = sadd.s32 4294967295, %s677_s17   ;;  %s476_s19 = sadd.s32 4294967294, %s677_s17   ;;  %s677_s17 = sphi %s712_s17, %s19_s17   ;;  %s673_s16 = sphi %s710_s16, %s902_s16   ;;  %s669_s15 = sphi %s708_s15, %s901_s15   ;;  %s665_s14 = sphi %s706_s14, %s900_s14   ;;  %s661_s13 = sphi %s704_s13, %s899_s13   ;;  %s657_s12 = sphi %s702_s12, %s898_s12  }
   0x7   : > { %s28_s20 = sadd.s32 1, %s673_s16  ;;  %s40_s21 = sadd.s32 1, %s665_s14 }
   0x8   : > { %p29_p0 = scmp.ge.s32.totalorder %s28_s20, 2  ;;  %p47_p1 = scmp.ne.s32.totalorder %s665_s14, %s661_s13 }
   0x9   : > { %p48_p2 = scmp.eq.s32.totalorder %s677_s17, 0  ;;  %p53_p3 = scmp.ne.s32.totalorder %s661_s13, %s657_s12 }
   0xa   : > { %s904_s20 = smov (%p29_p0, %s28_s20), 0  ;;  %p54_p5 = scmp.eq.s32.totalorder %s475_s18, 0 }
   0xb   : > { %p743_p4 = por %p48_p2, %p47_p1  ;;  %s35_s23 = ssub.s32 %s673_s16, %s904_s20 }
   0xc   : > { %p121_p6 = scmp.eq.s32.totalorder %s475_s18, 1  ;;  %p38_p7 = scmp.eq.s32.totalorder %s35_s23, 0 }
   0xd   : > { %p749_p8 = por %p54_p5, %p53_p3  ;;  %p127_p10 = scmp.eq.s32.totalorder %s476_s19, 1 }
   0xe   : > { %p753_p9 = por %p121_p6, %p47_p1  ;;  %p478_p12 = scmp.ge.s32.totalorder %s677_s17, 2 }
   0xf   : > { %s758_s26 = scalar_select %p38_p7, %s665_s14, %s40_s21  }
  0x10   : > { %p760_p11 = por %p127_p10, %p53_p3  ;;  %p503_p13 = scmp.lt.s32.totalorder %s677_s17, 2 }
  0x11   : > { %s153_s28 = sand.u32 1, %s665_s14   ;;  %s490_s30 = sshll.u32 %s673_s16, 5 }
  0x12   : > { %s479_s29 = sshll.u32 %s153_s28, 5  ;;  %s163_s6 = scalar_lea.hbm %s888_s0, %s490_s30 }
  0x13   : > { %s157_s7 = scalar_lea.vmem [#allocation2], %s479_s29  ;;  %s164_s9 = sshll.u32 %s163_s6, 4  ;;  %s165_s9 = int_to_ptr.hbm [resolvable:$true] %s164_s9 }
  0x14   : > { %s166_s8 = sshll.u32 %s157_s7, 4  ;;  %p496_p0 = pnand %p503_p13, %p743_p4  ;;  %s167_s8 = int_to_ptr.vmem [resolvable:$true] %s166_s8 }
  0x15   : > { %p482_p1 = scmp.ge.s32.totalorder %s677_s17, 1  ;;  %s154_s10 = scalar_lea.sflag [#allocation3], %s153_s28 }
  0x16   : > { %s679_s11 = smov 128   ;;  %s680_s18 = smov 8  }
  0x17   : > { %498 = dma.hbm_to_vmem [thread:$0]  (!%p496_p0), %s165_s9, 512, %s167_s8, %s154_s10, %s679_s11, %s679_s11, %s680_s18  }
  0x18   : > { %p174_p2 = scmp.lt.s32.totalorder %s677_s17, 3 }
  0x1a   : > { %p175_p3 = pnand %p482_p1, %p174_p2 }
  0x1b   : > { %s776_s19 = sand.u32 (!%p175_p3), 1, %s661_s13  }
  0x1c   : > { %178 = sbr.rel (%p175_p3) target bundleno = 216 (0xd8), region = 32  ;;  %s483_s21 = sshll.u32 (!%p175_p3), %s776_s19, 5 }
  0x1d   : > { %s181_s23 = scalar_lea.sflag (!%p175_p3), [#allocation3], %s776_s19  ;;  %s184_s29 = scalar_lea.vmem (!%p175_p3), [#allocation2], %s483_s21 }
  0x21   : > { %648 = dma.done.wait (%p749_p8), %s181_s23, 512  }
  0x22   : > { %650 = vsyncadd (%p749_p8), %s181_s23, 4294966784  ;;  %vm212_vm0 = vcmask 523264   ;;  %v784_v0 = vld [vmem:[%s184_s29 + $0x18] sm:$0xff]  ;;  %v786_v1 = vld [vmem:[%s184_s29 + $0x10] sm:$0xff]  ;;  %vm352_vm13 = vcmask 261120   ;;  %s484_s4 = sshll.u32 %s776_s19, 3 }
  0x23   : > { %v788_v2 = vld [vmem:[%s184_s29 + $0x8] sm:$0xff]  ;;  %v234_v3 = vsel %vm212_vm0, %v784_v0, 0.0  ;;  %v244_v4 = vmul.f32 %v784_v0, %v784_v0  ;;  %v227_v5 = vsel %vm212_vm0, %v786_v1, 0.0  ;;  %v243_v6 = vmul.f32 %v786_v1, %v786_v1  ;;  %v798_v7 = vld [vmem:[%s184_s29] sm:$0xff]  ;;  %s487_s5 = sshll.u32 %s669_s15, 3  ;;  %s207_s9 = scalar_lea.vmem [#allocation5], %s484_s4 }
  0x24   : > { %v235_v8 = vrot.slane %v234_v3, 4  ;;  %v228_v9 = vrot.slane %v227_v5, 4  ;;  %v220_v10 = vsel %vm212_vm0, %v788_v2, 0.0  ;;  %v242_v11 = vmul.f32 %v788_v2, %v788_v2  ;;  %s389_s8 = scalar_lea.hbm %s891_s3, %s487_s5  ;;  %s391_s10 = sshll.u32 %s207_s9, 4  ;;  %s392_s10 = int_to_ptr.vmem [resolvable:$true] %s391_s10 }
  0x25   : > { %v266_v12 = vsel %vm212_vm0, %v244_v4, 0.0  ;;  %v259_v13 = vsel %vm212_vm0, %v243_v6, 0.0  ;;  %v221_v14 = vrot.slane %v220_v10, 4  ;;  %v213_v15 = vsel %vm212_vm0, %v798_v7, 0.0  ;;  %s393_s11 = sshll.u32 %s389_s8, 4  ;;  %s378_s18 = scalar_lea.sflag [#allocation4], %s776_s19  ;;  %s394_s11 = int_to_ptr.hbm [resolvable:$true] %s393_s11 }
  0x26   : > { %v236_v16 = vadd.f32 %v235_v8, %v234_v3  ;;  %v267_v17 = vrot.slane %v266_v12, 4  ;;  %v229_v18 = vadd.f32 %v228_v9, %v227_v5  ;;  %v260_v19 = vrot.slane %v259_v13, 4  ;;  %s609_s21 = sshra.s32 %s394_s11, 4  ;;  %s615_s22 = scalar_lea.hbm %s891_s3, 16  ;;  %s610_s21 = int_to_ptr.hbm [resolvable:$true] %s609_s21 }
  0x27   : > { %v222_v20 = vadd.f32 %v221_v14, %v220_v10  ;;  %v252_v21 = vsel %vm212_vm0, %v242_v11, 0.0  ;;  %v214_v22 = vrot.slane %v213_v15, 4  ;;  %v241_v23 = vmul.f32 %v798_v7, %v798_v7  ;;  %s611_s23 = scalar_lea.hbm %s610_s21, 8  ;;  %p616_p7 = scmp.lt.s32.totalorder %s610_s21, %s891_s3 }
  0x28   : > { %v237_v24 = vrot.slane %v236_v16, 2  ;;  %v268_v25 = vadd.f32 %v267_v17, %v266_v12  ;;  %v230_v26 = vrot.slane %v229_v18, 2  ;;  %v261_v27 = vadd.f32 %v260_v19, %v259_v13  ;;  %p612_p4 = scmp.ne.s32.totalorder %s610_s21, %s611_s23  ;;  %p617_p8 = scmp.lt.s32.totalorder %s615_s22, %s611_s23 }
  0x29   : > { %v223_v28 = vrot.slane %v222_v20, 2  ;;  %v253_v29 = vrot.slane %v252_v21, 4  ;;  %v215_v30 = vadd.f32 %v214_v22, %v213_v15  ;;  %v245_v31 = vsel %vm212_vm0, %v241_v23, 0.0  ;;  %v346_v15 = vld [vmem:[%s890_s2] sm:$0xff] }
  0x2a   : > { %v238_v32 = vadd.f32 %v237_v24, %v236_v16  ;;  %v269_v33 = vrot.slane %v268_v25, 2  ;;  %v231_v34 = vadd.f32 %v230_v26, %v229_v18  ;;  %v262_v35 = vrot.slane %v261_v27, 2  ;;  %p613_p5 = pnand %p612_p4, %p753_p9  ;;  %p618_p10 = por %p617_p8, %p616_p7 }
  0x2b   : > { %v224_v36 = vadd.f32 %v223_v28, %v222_v20  ;;  %v254_v37 = vadd.f32 %v253_v29, %v252_v21  ;;  %v216_v38 = vrot.slane %v215_v30, 2  ;;  %v246_v39 = vrot.slane %v245_v31, 4 }
  0x2c   : > { %v239_v40 = vrot.slane %v238_v32, 1  ;;  %v270_v41 = vadd.f32 %v269_v33, %v268_v25  ;;  %v232_v42 = vrot.slane %v231_v34, 1  ;;  %v263_v43 = vadd.f32 %v262_v35, %v261_v27  ;;  %p614_p6 = pneg %p613_p5 }
  0x2d   : > { %v225_v44 = vrot.slane %v224_v36, 1  ;;  %v255_v45 = vrot.slane %v254_v37, 2  ;;  %v217_v46 = vadd.f32 %v216_v38, %v215_v30  ;;  %v247_v47 = vadd.f32 %v246_v39, %v245_v31 }
  0x2e   : > { %v240_v48 = vadd.f32 %v239_v40, %v238_v32  ;;  %v271_v49 = vrot.slane %v270_v41, 1  ;;  %v233_v50 = vadd.f32 %v232_v42, %v231_v34  ;;  %v264_v51 = vrot.slane %v263_v43, 1  ;;  %p619_p13 = pnand %p618_p10, %p614_p6 }
  0x2f   : > { %v226_v52 = vadd.f32 %v225_v44, %v224_v36  ;;  %v256_v53 = vadd.f32 %v255_v45, %v254_v37  ;;  %v218_v54 = vrot.slane %v217_v46, 1  ;;  %v248_v55 = vrot.slane %v247_v47, 2 }
  0x30   : > { %v272_v56 = vadd.f32 %v271_v49, %v270_v41  ;;  %v812_v57 = vmul.f32 0.25, %v240_v48  ;;  %v265_v58 = vadd.f32 %v264_v51, %v263_v43  ;;  %v814_v59 = vmul.f32 0.25, %v233_v50 }
  0x31   : > { %v257_v60 = vrot.slane %v256_v53, 1  ;;  %v816_v61 = vmul.f32 0.25, %v226_v52  ;;  %v219_v62 = vadd.f32 %v218_v54, %v217_v46  ;;  %v249_v63 = vadd.f32 %v248_v55, %v247_v47 }
  0x32   : > { %v280_v3 = vmul.f32 0.25, %v272_v56  ;;  %v284_v4 = vmul.f32 %v812_v57, %v812_v57  ;;  %v279_v5 = vmul.f32 0.25, %v265_v58  ;;  %v283_v6 = vmul.f32 %v814_v59, %v814_v59 }
  0x33   : > { %v258_v8 = vadd.f32 %v257_v60, %v256_v53  ;;  %v282_v9 = vmul.f32 %v816_v61, %v816_v61  ;;  %v250_v11 = vrot.slane %v249_v63, 1  ;;  %v824_v12 = vmul.f32 0.25, %v219_v62 }
  0x34   : > { %v288_v10 = vsub.f32 %v280_v3, %v284_v4  ;;  %v287_v13 = vsub.f32 %v279_v5, %v283_v6  ;;  %v681_v19 = vmov 0   ;;  %v296_v42 = vsub.f32 %v784_v0, %v812_v57  ;;  %v345_v3 = vld [vmem:[%s889_s1] sm:$0xff] }
  0x35   : > { %v278_v14 = vmul.f32 0.25, %v258_v8  ;;  %v251_v17 = vadd.f32 %v250_v11, %v249_v63  ;;  %v281_v18 = vmul.f32 %v824_v12, %v824_v12  ;;  %556 = vset.pattern.permute.xlu0 %v681_v19  ;;  %v295_v49 = vsub.f32 %v786_v1, %v814_v59 }
  0x36   : > { %v292_v16 = vmax.f32 %v288_v10, 0.0  ;;  %v291_v20 = vmax.f32 %v287_v13, 0.0  ;;  %349 = vperm.xlu0 %556, %v346_v15   ;;  %v294_v0 = vsub.f32 %v788_v2, %v816_v61  ;;  %v293_v2 = vsub.f32 %v798_v7, %v824_v12 }
  0x37   : > { %v286_v21 = vsub.f32 %v278_v14, %v282_v9  ;;  %v277_v23 = vmul.f32 0.25, %v251_v17 }
  0x38   : > { %v300_v22 = vadd.f32 1e-05, %v292_v16  ;;  %v299_v24 = vadd.f32 1e-05, %v291_v20 }
  0x39   : > { %v290_v25 = vmax.f32 %v286_v21, 0.0  ;;  %v285_v26 = vsub.f32 %v277_v23, %v281_v18 }
  0x3a   : > { %557 = vrsqrt.f32 %v300_v22  ;;  %vm337_vm1 = vweird.f32 %v300_v22  ;;  %vm327_vm3 = vweird.f32 %v299_v24 }
  0x3b   : > { %559 = vrsqrt.f32 %v299_v24  ;;  %v298_v27 = vadd.f32 1e-05, %v290_v25  ;;  %v289_v28 = vmax.f32 %v285_v26, 0.0 }
  0x3d   : > { %561 = vrsqrt.f32 %v298_v27  ;;  %v297_v29 = vadd.f32 1e-05, %v289_v28  ;;  %vm317_vm6 = vweird.f32 %v298_v27 }
  0x3f   : > { %563 = vrsqrt.f32 %v297_v29  ;;  %vm307_vm10 = vweird.f32 %v297_v29 }
  0x40   : > { %v558_v30 = vpop.eup %557 }
  0x41   : > { %v560_v31 = vpop.eup %559  ;;  %v332_v32 = vmul.f32 %v558_v30, %v300_v22  ;;  %vm338_vm2 = vweird.f32 %v558_v30 }
  0x42   : > { %v322_v33 = vmul.f32 %v560_v31, %v299_v24  ;;  %vm328_vm4 = vweird.f32 %v560_v31  ;;  %vm833_vm5 = vmor %vm337_vm1, %vm338_vm2 }
  0x43   : > { %v562_v34 = vpop.eup %561  ;;  %v333_v35 = vmul.f32 %v558_v30, %v332_v32  ;;  %vm329_vm8 = vmor %vm327_vm3, %vm328_vm4 }
  0x44   : > { %v323_v36 = vmul.f32 %v560_v31, %v322_v33  ;;  %v312_v37 = vmul.f32 %v562_v34, %v298_v27  ;;  %vm318_vm7 = vweird.f32 %v562_v34 }
  0x45   : > { %v334_v38 = vmul.f32 0.5, %v333_v35  ;;  %v564_v39 = vpop.eup %563  ;;  %vm319_vm9 = vmor %vm317_vm6, %vm318_vm7 }
  0x46   : > { %v324_v40 = vmul.f32 0.5, %v323_v36  ;;  %v313_v41 = vmul.f32 %v562_v34, %v312_v37  ;;  %v302_v44 = vmul.f32 %v564_v39, %v297_v29  ;;  %vm308_vm11 = vweird.f32 %v564_v39 }
  0x47   : > { %v335_v43 = vsub.f32 1.5, %v334_v38  ;;  %vm309_vm12 = vmor %vm307_vm10, %vm308_vm11 }
  0x48   : > { %v325_v46 = vsub.f32 1.5, %v324_v40  ;;  %v314_v47 = vmul.f32 0.5, %v313_v41  ;;  %v303_v50 = vmul.f32 %v564_v39, %v302_v44 }
  0x49   : > { %v336_v48 = vmul.f32 %v558_v30, %v335_v43 }
  0x4a   : > { %v326_v51 = vmul.f32 %v560_v31, %v325_v46  ;;  %v315_v52 = vsub.f32 1.5, %v314_v47  ;;  %v304_v54 = vmul.f32 0.5, %v303_v50 }
  0x4b   : > { %v340_v53 = vsel %vm833_vm5, %v558_v30, %v336_v48 }
  0x4c   : > { %v344_v55 = vmul.f32 %v340_v53, %v296_v42  ;;  %v330_v56 = vsel %vm329_vm8, %v560_v31, %v326_v51  ;;  %v316_v57 = vmul.f32 %v562_v34, %v315_v52  ;;  %v305_v1 = vsub.f32 1.5, %v304_v54 }
  0x4d   : > { %v343_v58 = vmul.f32 %v330_v56, %v295_v49 }
  0x4e   : > { %368 = vmatpush.msra.mxu0 %v344_v55  ;;  %v320_v59 = vsel %vm319_vm9, %v562_v34, %v316_v57  ;;  %v306_v61 = vmul.f32 %v564_v39, %v305_v1 }
  0x4f   : > { %v342_v60 = vmul.f32 %v320_v59, %v294_v0 }
  0x50   : > { %369 = vmatpush.msra.mxu0 %v343_v58  ;;  %v310_v62 = vsel %vm309_vm12, %v564_v39, %v306_v61 }
  0x51   : > { %v341_v63 = vmul.f32 %v310_v62, %v293_v2 }
  0x52   : > { %370 = vmatpush.msra.mxu0 %v342_v60 }
  0x54   : > { %371 = vmatpush.msra.mxu0 %v341_v63 }
  0x55   : > { %485 = vmatmul.msk.f32.vlgmr.msra.gmra.mxu0 %vm352_vm13, %v345_v3 }
  0xa8   : > { %v350_v7 = vpop.permute.xlu0 %349 }
  0xd2   : > { %v373_v4 = vpop.f32.mrf.mxu0 }
  0xd3   : > { %v374_v5 = vadd.f32 %v373_v4, %v350_v7 }
  0xd5   : > { %376 = vst.msk [vmem:[%s207_s9] sm:$0xff] %vm212_vm0, %v374_v5 }
  0xd6   : > { %622 = shalt.err (!%p619_p13)
}
  0xd7   : > { %493 = dma.vmem_to_hbm [thread:$0]  (%p753_p9), %s392_s10, 128, %s394_s11, %s378_s18  }
  0xd8 PF: > { %s405_s19 = sand.u32 1, %s657_s12   ;;  %p500_p0 = pnand %p478_p12, %p760_p11 }
  0xd9   : > { %s406_s30 = scalar_lea.sflag [#allocation4], %s405_s19 }
  0xda   : > { %p501_p1 = pneg %p500_p0 }
  0xdc   : > { %652 = dma.done.wait (%p501_p1), %s406_s30, 128  }
  0xdd   : > { %654 = vsyncadd (%p501_p1), %s406_s30, 4294967168  ;;  %s19_s17 = sadd.s32 1, %s677_s17   ;;  %s898_s12 = smov %s661_s13 }
  0xde   : > { %p16_p2 = scmp.ge.s32.totalorder %s19_s17, 4   ;;  %s899_s13 = smov %s665_s14 }
  0xdf   : > { %s900_s14 = smov %s758_s26  ;;  %s901_s15 = smov %s673_s16 }
  0xe0   : > { %s902_s16 = smov %s904_s20  ;;  %18 = sbr.rel (!%p16_p2) target bundleno = 6 (0x6), region = 77 }
  0xe5   :  { %412 = vsyncpa [#allocation3], 1 }
  0xe6   :  { %414 = vsyncpa [#allocation3 + $0x1], 1 }
  0xe7   :  { %415 = vsyncpa [#allocation4], 1 }
  0xe8   :  { %417 = vsyncpa [#allocation4 + $0x1], 1 }

</bundles_post_ra>
